<compile_context>
chip_gen: v7x
topology: tpu7x:2x2x1
jax: 0.10.0
libtpu: 0.0.40
codegen_flags: <defaults>
</compile_context>

<pallas_src>
import functools

import jax
import jax.numpy as jnp
from jax.experimental import pallas as pl
from jax.experimental.pallas import tpu as pltpu

EPS = 1e-5  # PyTorch BatchNorm1d default eps


def _round_up(n, m):
    return ((n + m - 1) // m) * m


def _pad2(a, shape, fill=0.0, dtype=None):
    dtype = a.dtype if dtype is None else dtype
    out = jnp.full(shape, fill, dtype)
    return out.at[: a.shape[0], : a.shape[1]].set(a.astype(dtype))


def encoder_kernel(
    # streamed along the F (contraction) axis
    x_ref, g1_ref, be1_ref, w1_ref,
    # VMEM-resident params
    b1_ref, g2_ref, be2_ref,
    wmu_ref, bmu_ref, wdg_ref, bdg_ref, wcf_ref, bcf_ref,
    tril_ref, diag_ref,
    # outputs
    mu_ref, cov_ref,
    # scratch
    acc_ref,
):
    k = pl.program_id(0)

    @pl.when(k == 0)
    def _init():
        acc_ref[...] = jnp.zeros_like(acc_ref)

    # Dropout(p=0) is an identity.  bn_pp: per-feature batch stats on this tile
    # (exact: BN statistics are independent per feature column).
    x = x_ref[...]                                      # [B, block_k] f32
    mean1 = jnp.mean(x, axis=0, keepdims=True)
    xc = x - mean1                                      # centered once, reused
    var1 = jnp.mean(xc * xc, axis=0, keepdims=True)     # biased var (train mode)
    xn = xc * jax.lax.rsqrt(var1 + EPS) * g1_ref[...] + be1_ref[...]

    # Partial first matmul: accumulate this F tile (bf16 operands, f32 accumulate).
    acc_ref[...] += jnp.dot(
        xn.astype(jnp.bfloat16), w1_ref[...], preferred_element_type=jnp.float32
    )

    @pl.when(k == pl.num_programs(0) - 1)
    def _epilogue():
        z = acc_ref[...] + b1_ref[...]                  # [B, H_pad]

        # bn over hidden (batch stats, affine), then ReLU.
        m2 = jnp.mean(z, axis=0, keepdims=True)
        zc = z - m2
        v2 = jnp.mean(zc * zc, axis=0, keepdims=True)
        h = jnp.maximum(
            zc * jax.lax.rsqrt(v2 + EPS) * g2_ref[...] + be2_ref[...], 0.0
        )
        hb = h.astype(jnp.bfloat16)

        # mu_topic head + norm_topic (batch stats, affine=False).
        mu = jnp.dot(hb, wmu_ref[...], preferred_element_type=jnp.float32) + bmu_ref[...]
        m3 = jnp.mean(mu, axis=0, keepdims=True)
        muc = mu - m3
        v3 = jnp.mean(muc * muc, axis=0, keepdims=True)
        mu_ref[...] = muc * jax.lax.rsqrt(v3 + EPS)

        # diag_topic head + softplus (matches PyTorch threshold=20 behavior).
        dg = jnp.dot(hb, wdg_ref[...], preferred_element_type=jnp.float32) + bdg_ref[...]
        dg_sp = jnp.where(dg > 20.0, dg, jnp.log(1.0 + jnp.exp(jnp.minimum(dg, 20.0))))

        # cov_factor head.
        cf = jnp.dot(hb, wcf_ref[...], preferred_element_type=jnp.float32) + bcf_ref[...]

        # cov[b] = strict-lower-tri scatter of cf + diag_embed(dg_sp), realised as
        # two exact 0/1 selection matmuls into a lane-dense [B, TT_pad] slab
        # (kept in f32 so the scattered values are untouched).
        cov_ref[...] = (
            jnp.dot(cf, tril_ref[...], preferred_element_type=jnp.float32)
            + jnp.dot(dg_sp, diag_ref[...], preferred_element_type=jnp.float32)
        )


def mlp_encoder_mvn(x, params, n_topics, *, block_k=512):
    """x: [B, F] float32; params: unpadded f32 dict (weights stored [in, out] ==
    torch_weight.T).  Returns (mu_topic [B, T], cov [B, T, T])."""
    B, F = x.shape
    H = params["w1"].shape[1]
    T = int(n_topics)
    K = T * (T - 1) // 2

    assert block_k % 128 == 0, "block_k must be a multiple of 128 lanes"
    F_pad = _round_up(F, block_k)
    H_pad = _round_up(H, 128)
    T_pad = _round_up(T, 128)
    K_pad = max(_round_up(K, 128), 128)
    TT_pad = max(_round_up(T * T, 128), 128)

    f32, bf16 = jnp.float32, jnp.bfloat16

    # Zero-padded / cast operands.  Pads are chosen so padded rows/cols remain
    # exactly 0 through every stage.
    xp = _pad2(x.astype(f32), (B, F_pad))
    g1 = _pad2(params["bn_pp_gamma"].reshape(1, F).astype(f32), (1, F_pad), fill=1.0)
    be1 = _pad2(params["bn_pp_beta"].reshape(1, F).astype(f32), (1, F_pad))
    w1 = _pad2(params["w1"], (F_pad, H_pad), dtype=bf16)
    b1 = _pad2(params["b1"].reshape(1, H).astype(f32), (1, H_pad))
    g2 = _pad2(params["bn_gamma"].reshape(1, H).astype(f32), (1, H_pad), fill=1.0)
    be2 = _pad2(params["bn_beta"].reshape(1, H).astype(f32), (1, H_pad))
    wmu = _pad2(params["w_mu"], (H_pad, T_pad), dtype=bf16)
    bmu = _pad2(params["b_mu"].reshape(1, T).astype(f32), (1, T_pad))
    wdg = _pad2(params["w_dg"], (H_pad, T_pad), dtype=bf16)
    bdg = _pad2(params["b_dg"].reshape(1, T).astype(f32), (1, T_pad))
    wcf = _pad2(params["w_cf"], (H_pad, K_pad), dtype=bf16)
    bcf = _pad2(params["b_cf"].reshape(1, K).astype(f32), (1, K_pad))

    # Constant 0/1 selection matrices for the covariance assembly.
    # jnp.tril_indices(T, -1) ordering (row-major) matches torch.tril_indices.
    tril = jnp.zeros((K_pad, TT_pad), f32)
    if K > 0:
        r_idx, c_idx = jnp.tril_indices(T, k=-1)
        tril = tril.at[jnp.arange(K), r_idx * T + c_idx].set(1.0)
    d_idx = jnp.arange(T)
    diag = jnp.zeros((T_pad, TT_pad), f32).at[d_idx, d_idx * T + d_idx].set(1.0)

    grid = (F_pad // block_k,)

    def stream_act(k):      # x / bn_pp gamma / bn_pp beta walk along F
        return (0, k)

    def stream_w1(k):       # w1 walks along its F (row) axis
        return (k, 0)

    def resident(k):        # small params / outputs: same block every step
        return (0, 0)

    in_specs = [
        pl.BlockSpec((B, block_k), stream_act),        # x
        pl.BlockSpec((1, block_k), stream_act),        # bn_pp gamma
        pl.BlockSpec((1, block_k), stream_act),        # bn_pp beta
        pl.BlockSpec((block_k, H_pad), stream_w1),     # w1 (bf16)
        pl.BlockSpec((1, H_pad), resident),            # b1
        pl.BlockSpec((1, H_pad), resident),            # bn gamma
        pl.BlockSpec((1, H_pad), resident),            # bn beta
        pl.BlockSpec((H_pad, T_pad), resident),        # w_mu (bf16)
        pl.BlockSpec((1, T_pad), resident),            # b_mu
        pl.BlockSpec((H_pad, T_pad), resident),        # w_dg (bf16)
        pl.BlockSpec((1, T_pad), resident),            # b_dg
        pl.BlockSpec((H_pad, K_pad), resident),        # w_cf (bf16)
        pl.BlockSpec((1, K_pad), resident),            # b_cf
        pl.BlockSpec((K_pad, TT_pad), resident),       # tril selection matrix
        pl.BlockSpec((T_pad, TT_pad), resident),       # diag selection matrix
    ]
    out_specs = (
        pl.BlockSpec((B, T_pad), resident),            # mu  (lane dense)
        pl.BlockSpec((B, TT_pad), resident),           # cov (flat, lane dense)
    )

    mu_pad, cov_flat = pl.pallas_call(
        encoder_kernel,
        out_shape=(
            jax.ShapeDtypeStruct((B, T_pad), f32),
            jax.ShapeDtypeStruct((B, TT_pad), f32),
        ),
        grid=grid,
        in_specs=in_specs,
        out_specs=out_specs,
        scratch_shapes=[pltpu.VMEM((B, H_pad), f32)],
        compiler_params=pltpu.CompilerParams(
            dimension_semantics=("arbitrary",),         # F is a reduction axis
            vmem_limit_bytes=48 * 1024 * 1024,          # explicit; fits v5e/v6e/v7x
        ),
    )(xp, g1, be1, w1, b1, g2, be2, wmu, bmu, wdg, bdg, wcf, bcf, tril, diag)

    mu = mu_pad[:, :T]
    cov = cov_flat[:, : T * T].reshape(B, T, T)
    return mu, cov


def reference_forward(x, params, n_topics):
    """Pure-JAX f32 reference mirroring the PyTorch forward (train mode, ys=None)."""
    def bn(v, gamma=None, beta=None):
        m = jnp.mean(v, axis=0, keepdims=True)
        var = jnp.mean((v - m) ** 2, axis=0, keepdims=True)
        out = (v - m) / jnp.sqrt(var + EPS)
        if gamma is not None:
            out = out * gamma + beta
        return out

    xn = bn(x, params["bn_pp_gamma"], params["bn_pp_beta"])
    z = xn @ params["w1"] + params["b1"]
    h = jax.nn.relu(bn(z, params["bn_gamma"], params["bn_beta"]))
    mu = bn(h @ params["w_mu"] + params["b_mu"])
    dg = jax.nn.softplus(h @ params["w_dg"] + params["b_dg"])
    cf = h @ params["w_cf"] + params["b_cf"]

    T, B = int(n_topics), x.shape[0]
    r_idx, c_idx = jnp.tril_indices(T, k=-1)
    cov = jnp.zeros((B, T, T), jnp.float32).at[:, r_idx, c_idx].set(cf)
    cov = cov + dg[:, :, None] * jnp.eye(T, dtype=jnp.float32)
    return mu, cov


def init_params(key, n_genes, hidden_size, n_topics, n_layers, head_scale=0.0):
    """Mirror MLPEncoderMVN.reset_parameters (xavier_normal for linear/mu_topic,
    zeros elsewhere).  head_scale > 0 perturbs the zero-initialised
    diag_topic/cov_factor params so the demo exercises those data paths."""
    F = n_genes * (n_layers + 1)
    H, T = hidden_size, n_topics
    K = T * (T - 1) // 2
    ks = jax.random.split(key, 6)

    def xavier_normal(k, fan_in, fan_out):
        std = (2.0 / (fan_in + fan_out)) ** 0.5
        return std * jax.random.normal(k, (fan_in, fan_out), jnp.float32)

    return {
        "bn_pp_gamma": jnp.ones((F,), jnp.float32),
        "bn_pp_beta": jnp.zeros((F,), jnp.float32),
        "bn_gamma": jnp.ones((H,), jnp.float32),
        "bn_beta": jnp.zeros((H,), jnp.float32),
        "w1": xavier_normal(ks[0], F, H),                 # linear.weight.T
        "b1": jnp.zeros((H,), jnp.float32),
        "w_mu": xavier_normal(ks[1], H, T),               # mu_topic.weight.T
        "b_mu": jnp.zeros((T,), jnp.float32),
        "w_dg": head_scale * jax.random.normal(ks[2], (H, T), jnp.float32),
        "b_dg": head_scale * jax.random.normal(ks[3], (T,), jnp.float32),
        "w_cf": head_scale * jax.random.normal(ks[4], (H, K), jnp.float32),
        "b_cf": head_scale * jax.random.normal(ks[5], (K,), jnp.float32),
    }


if __name__ == "__main__":
    # Small config consistent with the module: F = n_genes * (n_layers + 1) = 256.
    n_genes, hidden_size, n_topics, n_layers = 64, 32, 16, 3
    batch = 8
    F = n_genes * (n_layers + 1)

    key = jax.random.PRNGKey(0)
    kx, kp = jax.random.split(key)
    x = jax.random.normal(kx, (batch, F), dtype=jnp.float32)
    params = init_params(kp, n_genes, hidden_size, n_topics, n_layers, head_scale=0.05)

    fwd = jax.jit(functools.partial(mlp_encoder_mvn, n_topics=n_topics, block_k=128))
    mu, cov = jax.block_until_ready(fwd(x, params))

    mu_ref, cov_ref = reference_forward(x, params, n_topics)

    assert mu.shape == (batch, n_topics)
    assert cov.shape == (batch, n_topics, n_topics)
    assert bool(jnp.all(jnp.isfinite(mu))) and bool(jnp.all(jnp.isfinite(cov)))
    # bf16 matmul operands with f32 accumulation -> loose tolerance vs f32 reference.
    assert bool(jnp.allclose(mu, mu_ref, atol=5e-2, rtol=5e-2))
    assert bool(jnp.allclose(cov, cov_ref, atol=5e-2, rtol=5e-2))
    # Strictly-upper-triangular entries of cov must be exactly zero.
    iu_r, iu_c = jnp.triu_indices(n_topics, k=1)
    assert bool(jnp.all(cov[:, iu_r, iu_c] == 0.0))

    print("KERNEL_OK")
</pallas_src>

<mosaic_0001>
module attributes {stable_mosaic.version = 11 : i64} {
  func.func private @main(%arg0: i32) attributes {dimension_semantics = [#tpu.dimension_semantics<core_parallel>], iteration_bounds = array<i64: 2>, tpu.core_type = #tpu.core_type<sc_scalar_subcore>, window_params = []} {
    return
  }
}

module attributes {stable_mosaic.version = 11 : i64} {
  func.func private @main(%arg0: i32) attributes {dimension_semantics = [#tpu.dimension_semantics<core_parallel>], iteration_bounds = array<i64: 2>, tpu.core_type = #tpu.core_type<sc_scalar_subcore>, window_params = []} {
    return
  }
}

module attributes {stable_mosaic.version = 11 : i64} {
  func.func @encoder_kernel(%arg0: i32, %arg1: memref<8x128xf32, #tpu.memory_space<vmem>>, %arg2: memref<1x128xf32, #tpu.memory_space<vmem>>, %arg3: memref<1x128xf32, #tpu.memory_space<vmem>>, %arg4: memref<128x128xbf16, #tpu.memory_space<vmem>>, %arg5: memref<1x128xf32, #tpu.memory_space<vmem>>, %arg6: memref<1x128xf32, #tpu.memory_space<vmem>>, %arg7: memref<1x128xf32, #tpu.memory_space<vmem>>, %arg8: memref<128x128xbf16, #tpu.memory_space<vmem>>, %arg9: memref<1x128xf32, #tpu.memory_space<vmem>>, %arg10: memref<128x128xbf16, #tpu.memory_space<vmem>>, %arg11: memref<1x128xf32, #tpu.memory_space<vmem>>, %arg12: memref<128x128xbf16, #tpu.memory_space<vmem>>, %arg13: memref<1x128xf32, #tpu.memory_space<vmem>>, %arg14: memref<128x256xf32, #tpu.memory_space<vmem>>, %arg15: memref<128x256xf32, #tpu.memory_space<vmem>>, %arg16: memref<8x128xf32, #tpu.memory_space<vmem>>, %arg17: memref<8x256xf32, #tpu.memory_space<vmem>>, %arg18: memref<8x128xf32, #tpu.memory_space<vmem>>) attributes {dimension_semantics = [#tpu.dimension_semantics<arbitrary>], iteration_bounds = array<i64: 2>, scalar_prefetch = 0 : i64, scratch_operands = 1 : i64, tpu.core_type = #tpu.core_type<tc>, window_params = [{transform_indices = @transform_0, window_bounds = array<i64: 8, 128>}, {transform_indices = @transform_1, window_bounds = array<i64: 1, 128>}, {transform_indices = @transform_2, window_bounds = array<i64: 1, 128>}, {transform_indices = @transform_3, window_bounds = array<i64: 128, 128>}, {pipeline_mode = #tpu.pipeline_mode<synchronous>, transform_indices = @transform_4, window_bounds = array<i64: 1, 128>}, {pipeline_mode = #tpu.pipeline_mode<synchronous>, transform_indices = @transform_5, window_bounds = array<i64: 1, 128>}, {pipeline_mode = #tpu.pipeline_mode<synchronous>, transform_indices = @transform_6, window_bounds = array<i64: 1, 128>}, {pipeline_mode = #tpu.pipeline_mode<synchronous>, transform_indices = @transform_7, window_bounds = array<i64: 128, 128>}, {pipeline_mode = #tpu.pipeline_mode<synchronous>, transform_indices = @transform_8, window_bounds = array<i64: 1, 128>}, {pipeline_mode = #tpu.pipeline_mode<synchronous>, transform_indices = @transform_9, window_bounds = array<i64: 128, 128>}, {pipeline_mode = #tpu.pipeline_mode<synchronous>, transform_indices = @transform_10, window_bounds = array<i64: 1, 128>}, {pipeline_mode = #tpu.pipeline_mode<synchronous>, transform_indices = @transform_11, window_bounds = array<i64: 128, 128>}, {pipeline_mode = #tpu.pipeline_mode<synchronous>, transform_indices = @transform_12, window_bounds = array<i64: 1, 128>}, {pipeline_mode = #tpu.pipeline_mode<synchronous>, transform_indices = @transform_13, window_bounds = array<i64: 128, 256>}, {pipeline_mode = #tpu.pipeline_mode<synchronous>, transform_indices = @transform_14, window_bounds = array<i64: 128, 256>}, {pipeline_mode = #tpu.pipeline_mode<synchronous>, transform_indices = @transform_15, window_bounds = array<i64: 8, 128>}, {pipeline_mode = #tpu.pipeline_mode<synchronous>, transform_indices = @transform_16, window_bounds = array<i64: 8, 256>}]} {
    %c0_i32 = arith.constant 0 : i32
    %0 = arith.cmpi eq, %arg0, %c0_i32 : i32
    %1 = arith.extui %0 : i1 to i32
    %c0_i32_0 = arith.constant 0 : i32
    %2 = arith.cmpi ne, %1, %c0_i32_0 : i32
    scf.if %2 {
      %cst_18 = arith.constant 0.000000e+00 : f32
      %35 = vector.broadcast %cst_18 : f32 to vector<8x128xf32>
      %c0_19 = arith.constant 0 : index
      %c0_20 = arith.constant 0 : index
      %36 = vector.load %arg18[%c0_19, %c0_20] : memref<8x128xf32, #tpu.memory_space<vmem>>, vector<8x128xf32>
      tpu.vector_store %arg18[%c0_19, %c0_20], %35 {strides = array<i32>} : memref<8x128xf32, #tpu.memory_space<vmem>>, vector<8x128xf32>,
    } else {
    }
    %c0 = arith.constant 0 : index
    %c0_1 = arith.constant 0 : index
    %3 = vector.load %arg1[%c0, %c0_1] : memref<8x128xf32, #tpu.memory_space<vmem>>, vector<8x128xf32>
    %cst = arith.constant dense<0.000000e+00> : vector<128xf32>
    %4 = vector.multi_reduction <add>, %3, %cst [0] : vector<8x128xf32> to vector<128xf32>
    %5 = vector.shape_cast %4 : vector<128xf32> to vector<1x128xf32>
    %cst_2 = arith.constant 8.000000e+00 : f32
    %6 = vector.broadcast %cst_2 : f32 to vector<1x128xf32>
    %7 = arith.divf %5, %6 : vector<1x128xf32>
    %8 = vector.broadcast %7 : vector<1x128xf32> to vector<8x128xf32>
    %9 = arith.subf %3, %8 : vector<8x128xf32>
    %10 = arith.mulf %9, %9 : vector<8x128xf32>
    %cst_3 = arith.constant dense<0.000000e+00> : vector<128xf32>
    %11 = vector.multi_reduction <add>, %10, %cst_3 [0] : vector<8x128xf32> to vector<128xf32>
    %12 = vector.shape_cast %11 : vector<128xf32> to vector<1x128xf32>
    %cst_4 = arith.constant 8.000000e+00 : f32
    %13 = vector.broadcast %cst_4 : f32 to vector<1x128xf32>
    %14 = arith.divf %12, %13 : vector<1x128xf32>
    %cst_5 = arith.constant 9.99999974E-6 : f32
    %15 = vector.broadcast %cst_5 : f32 to vector<1x128xf32>
    %16 = arith.addf %14, %15 : vector<1x128xf32>
    %17 = math.rsqrt %16 : vector<1x128xf32>
    %18 = vector.broadcast %17 : vector<1x128xf32> to vector<8x128xf32>
    %19 = arith.mulf %9, %18 : vector<8x128xf32>
    %c0_6 = arith.constant 0 : index
    %c0_7 = arith.constant 0 : index
    %20 = vector.load %arg2[%c0_6, %c0_7] : memref<1x128xf32, #tpu.memory_space<vmem>>, vector<1x128xf32>
    %21 = vector.broadcast %20 : vector<1x128xf32> to vector<8x128xf32>
    %22 = arith.mulf %19, %21 : vector<8x128xf32>
    %c0_8 = arith.constant 0 : index
    %c0_9 = arith.constant 0 : index
    %23 = vector.load %arg3[%c0_8, %c0_9] : memref<1x128xf32, #tpu.memory_space<vmem>>, vector<1x128xf32>
    %24 = vector.broadcast %23 : vector<1x128xf32> to vector<8x128xf32>
    %25 = arith.addf %22, %24 : vector<8x128xf32>
    %c0_10 = arith.constant 0 : index
    %c0_11 = arith.constant 0 : index
    %26 = vector.load %arg18[%c0_10, %c0_11] : memref<8x128xf32, #tpu.memory_space<vmem>>, vector<8x128xf32>
    %27 = arith.truncf %25 : vector<8x128xf32> to vector<8x128xbf16>
    %c0_12 = arith.constant 0 : index
    %c0_13 = arith.constant 0 : index
    %28 = vector.load %arg4[%c0_12, %c0_13] : memref<128x128xbf16, #tpu.memory_space<vmem>>, vector<128x128xbf16>
    %cst_14 = arith.constant dense<0.000000e+00> : vector<8x128xf32>
    %29 = tpu.matmul %27, %28, %cst_14 {dimension_numbers = #tpu.dot_dimension_numbers<[1], [0], [0], [1], [0, 0, 1, 1], [], []>} : vector<8x128xbf16>, vector<128x128xbf16>, vector<8x128xf32> -> vector<8x128xf32>
    %30 = arith.addf %26, %29 : vector<8x128xf32>
    %c0_15 = arith.constant 0 : index
    %c0_16 = arith.constant 0 : index
    %31 = vector.load %arg18[%c0_15, %c0_16] : memref<8x128xf32, #tpu.memory_space<vmem>>, vector<8x128xf32>
    tpu.vector_store %arg18[%c0_15, %c0_16], %30 {strides = array<i32>} : memref<8x128xf32, #tpu.memory_space<vmem>>, vector<8x128xf32>,
    %c1_i32 = arith.constant 1 : i32
    %32 = arith.cmpi eq, %arg0, %c1_i32 : i32
    %33 = arith.extui %32 : i1 to i32
    %c0_i32_17 = arith.constant 0 : i32
    %34 = arith.cmpi ne, %33, %c0_i32_17 : i32
    scf.if %34 {
      %c0_18 = arith.constant 0 : index
      %c0_19 = arith.constant 0 : index
      %35 = vector.load %arg18[%c0_18, %c0_19] : memref<8x128xf32, #tpu.memory_space<vmem>>, vector<8x128xf32>
      %c0_20 = arith.constant 0 : index
      %c0_21 = arith.constant 0 : index
      %36 = vector.load %arg5[%c0_20, %c0_21] : memref<1x128xf32, #tpu.memory_space<vmem>>, vector<1x128xf32>
      %37 = vector.broadcast %36 : vector<1x128xf32> to vector<8x128xf32>
      %38 = arith.addf %35, %37 : vector<8x128xf32>
      %cst_22 = arith.constant dense<0.000000e+00> : vector<128xf32>
      %39 = vector.multi_reduction <add>, %38, %cst_22 [0] : vector<8x128xf32> to vector<128xf32>
      %40 = vector.shape_cast %39 : vector<128xf32> to vector<1x128xf32>
      %cst_23 = arith.constant 8.000000e+00 : f32
      %41 = vector.broadcast %cst_23 : f32 to vector<1x128xf32>
      %42 = arith.divf %40, %41 : vector<1x128xf32>
      %43 = vector.broadcast %42 : vector<1x128xf32> to vector<8x128xf32>
      %44 = arith.subf %38, %43 : vector<8x128xf32>
      %45 = arith.mulf %44, %44 : vector<8x128xf32>
      %cst_24 = arith.constant dense<0.000000e+00> : vector<128xf32>
      %46 = vector.multi_reduction <add>, %45, %cst_24 [0] : vector<8x128xf32> to vector<128xf32>
      %47 = vector.shape_cast %46 : vector<128xf32> to vector<1x128xf32>
      %cst_25 = arith.constant 8.000000e+00 : f32
      %48 = vector.broadcast %cst_25 : f32 to vector<1x128xf32>
      %49 = arith.divf %47, %48 : vector<1x128xf32>
      %cst_26 = arith.constant 9.99999974E-6 : f32
      %50 = vector.broadcast %cst_26 : f32 to vector<1x128xf32>
      %51 = arith.addf %49, %50 : vector<1x128xf32>
      %52 = math.rsqrt %51 : vector<1x128xf32>
      %53 = vector.broadcast %52 : vector<1x128xf32> to vector<8x128xf32>
      %54 = arith.mulf %44, %53 : vector<8x128xf32>
      %c0_27 = arith.constant 0 : index
      %c0_28 = arith.constant 0 : index
      %55 = vector.load %arg6[%c0_27, %c0_28] : memref<1x128xf32, #tpu.memory_space<vmem>>, vector<1x128xf32>
      %56 = vector.broadcast %55 : vector<1x128xf32> to vector<8x128xf32>
      %57 = arith.mulf %54, %56 : vector<8x128xf32>
      %c0_29 = arith.constant 0 : index
      %c0_30 = arith.constant 0 : index
      %58 = vector.load %arg7[%c0_29, %c0_30] : memref<1x128xf32, #tpu.memory_space<vmem>>, vector<1x128xf32>
      %59 = vector.broadcast %58 : vector<1x128xf32> to vector<8x128xf32>
      %60 = arith.addf %57, %59 : vector<8x128xf32>
      %cst_31 = arith.constant 0.000000e+00 : f32
      %61 = vector.broadcast %cst_31 : f32 to vector<8x128xf32>
      %62 = arith.maximumf %60, %61 : vector<8x128xf32>
      %63 = arith.truncf %62 : vector<8x128xf32> to vector<8x128xbf16>
      %c0_32 = arith.constant 0 : index
      %c0_33 = arith.constant 0 : index
      %64 = vector.load %arg8[%c0_32, %c0_33] : memref<128x128xbf16, #tpu.memory_space<vmem>>, vector<128x128xbf16>
      %cst_34 = arith.constant dense<0.000000e+00> : vector<8x128xf32>
      %65 = tpu.matmul %63, %64, %cst_34 {dimension_numbers = #tpu.dot_dimension_numbers<[1], [0], [0], [1], [0, 0, 1, 1], [], []>} : vector<8x128xbf16>, vector<128x128xbf16>, vector<8x128xf32> -> vector<8x128xf32>
      %c0_35 = arith.constant 0 : index
      %c0_36 = arith.constant 0 : index
      %66 = vector.load %arg9[%c0_35, %c0_36] : memref<1x128xf32, #tpu.memory_space<vmem>>, vector<1x128xf32>
      %67 = vector.broadcast %66 : vector<1x128xf32> to vector<8x128xf32>
      %68 = arith.addf %65, %67 : vector<8x128xf32>
      %cst_37 = arith.constant dense<0.000000e+00> : vector<128xf32>
      %69 = vector.multi_reduction <add>, %68, %cst_37 [0] : vector<8x128xf32> to vector<128xf32>
      %70 = vector.shape_cast %69 : vector<128xf32> to vector<1x128xf32>
      %cst_38 = arith.constant 8.000000e+00 : f32
      %71 = vector.broadcast %cst_38 : f32 to vector<1x128xf32>
      %72 = arith.divf %70, %71 : vector<1x128xf32>
      %73 = vector.broadcast %72 : vector<1x128xf32> to vector<8x128xf32>
      %74 = arith.subf %68, %73 : vector<8x128xf32>
      %75 = arith.mulf %74, %74 : vector<8x128xf32>
      %cst_39 = arith.constant dense<0.000000e+00> : vector<128xf32>
      %76 = vector.multi_reduction <add>, %75, %cst_39 [0] : vector<8x128xf32> to vector<128xf32>
      %77 = vector.shape_cast %76 : vector<128xf32> to vector<1x128xf32>
      %cst_40 = arith.constant 8.000000e+00 : f32
      %78 = vector.broadcast %cst_40 : f32 to vector<1x128xf32>
      %79 = arith.divf %77, %78 : vector<1x128xf32>
      %cst_41 = arith.constant 9.99999974E-6 : f32
      %80 = vector.broadcast %cst_41 : f32 to vector<1x128xf32>
      %81 = arith.addf %79, %80 : vector<1x128xf32>
      %82 = math.rsqrt %81 : vector<1x128xf32>
      %83 = vector.broadcast %82 : vector<1x128xf32> to vector<8x128xf32>
      %84 = arith.mulf %74, %83 : vector<8x128xf32>
      %c0_42 = arith.constant 0 : index
      %c0_43 = arith.constant 0 : index
      %85 = vector.load %arg16[%c0_42, %c0_43] : memref<8x128xf32, #tpu.memory_space<vmem>>, vector<8x128xf32>
      tpu.vector_store %arg16[%c0_42, %c0_43], %84 {strides = array<i32>} : memref<8x128xf32, #tpu.memory_space<vmem>>, vector<8x128xf32>,
      %c0_44 = arith.constant 0 : index
      %c0_45 = arith.constant 0 : index
      %86 = vector.load %arg10[%c0_44, %c0_45] : memref<128x128xbf16, #tpu.memory_space<vmem>>, vector<128x128xbf16>
      %cst_46 = arith.constant dense<0.000000e+00> : vector<8x128xf32>
      %87 = tpu.matmul %63, %86, %cst_46 {dimension_numbers = #tpu.dot_dimension_numbers<[1], [0], [0], [1], [0, 0, 1, 1], [], []>} : vector<8x128xbf16>, vector<128x128xbf16>, vector<8x128xf32> -> vector<8x128xf32>
      %c0_47 = arith.constant 0 : index
      %c0_48 = arith.constant 0 : index
      %88 = vector.load %arg11[%c0_47, %c0_48] : memref<1x128xf32, #tpu.memory_space<vmem>>, vector<1x128xf32>
      %89 = vector.broadcast %88 : vector<1x128xf32> to vector<8x128xf32>
      %90 = arith.addf %87, %89 : vector<8x128xf32>
      %cst_49 = arith.constant 2.000000e+01 : f32
      %91 = vector.broadcast %cst_49 : f32 to vector<8x128xf32>
      %92 = arith.cmpf ogt, %90, %91 : vector<8x128xf32>
      %cst_50 = arith.constant 2.000000e+01 : f32
      %93 = vector.broadcast %cst_50 : f32 to vector<8x128xf32>
      %94 = arith.minimumf %90, %93 : vector<8x128xf32>
      %95 = math.exp %94 : vector<8x128xf32>
      %cst_51 = arith.constant 1.000000e+00 : f32
      %96 = vector.broadcast %cst_51 : f32 to vector<8x128xf32>
      %97 = arith.addf %96, %95 : vector<8x128xf32>
      %98 = math.log %97 : vector<8x128xf32>
      %99 = arith.select %92, %90, %98 : vector<8x128xi1>, vector<8x128xf32>
      %c0_52 = arith.constant 0 : index
      %c0_53 = arith.constant 0 : index
      %100 = vector.load %arg12[%c0_52, %c0_53] : memref<128x128xbf16, #tpu.memory_space<vmem>>, vector<128x128xbf16>
      %cst_54 = arith.constant dense<0.000000e+00> : vector<8x128xf32>
      %101 = tpu.matmul %63, %100, %cst_54 {dimension_numbers = #tpu.dot_dimension_numbers<[1], [0], [0], [1], [0, 0, 1, 1], [], []>} : vector<8x128xbf16>, vector<128x128xbf16>, vector<8x128xf32> -> vector<8x128xf32>
      %c0_55 = arith.constant 0 : index
      %c0_56 = arith.constant 0 : index
      %102 = vector.load %arg13[%c0_55, %c0_56] : memref<1x128xf32, #tpu.memory_space<vmem>>, vector<1x128xf32>
      %103 = vector.broadcast %102 : vector<1x128xf32> to vector<8x128xf32>
      %104 = arith.addf %101, %103 : vector<8x128xf32>
      %c0_57 = arith.constant 0 : index
      %c0_58 = arith.constant 0 : index
      %105 = vector.load %arg14[%c0_57, %c0_58] : memref<128x256xf32, #tpu.memory_space<vmem>>, vector<128x256xf32>
      %cst_59 = arith.constant dense<0.000000e+00> : vector<8x256xf32>
      %106 = tpu.matmul %104, %105, %cst_59 {dimension_numbers = #tpu.dot_dimension_numbers<[1], [0], [0], [1], [0, 0, 1, 1], [], []>} : vector<8x128xf32>, vector<128x256xf32>, vector<8x256xf32> -> vector<8x256xf32>
      %c0_60 = arith.constant 0 : index
      %c0_61 = arith.constant 0 : index
      %107 = vector.load %arg15[%c0_60, %c0_61] : memref<128x256xf32, #tpu.memory_space<vmem>>, vector<128x256xf32>
      %cst_62 = arith.constant dense<0.000000e+00> : vector<8x256xf32>
      %108 = tpu.matmul %99, %107, %cst_62 {dimension_numbers = #tpu.dot_dimension_numbers<[1], [0], [0], [1], [0, 0, 1, 1], [], []>} : vector<8x128xf32>, vector<128x256xf32>, vector<8x256xf32> -> vector<8x256xf32>
      %109 = arith.addf %106, %108 : vector<8x256xf32>
      %c0_63 = arith.constant 0 : index
      %c0_64 = arith.constant 0 : index
      %110 = vector.load %arg17[%c0_63, %c0_64] : memref<8x256xf32, #tpu.memory_space<vmem>>, vector<8x256xf32>
      tpu.vector_store %arg17[%c0_63, %c0_64], %109 {strides = array<i32>} : memref<8x256xf32, #tpu.memory_space<vmem>>, vector<8x256xf32>,
    } else {
    }
    return
  }
  func.func @transform_0(%arg0: i32) -> (i32, i32) {
    %c0_i32 = arith.constant 0 : i32
    %c0_i32_0 = arith.constant 0 : i32
    return %c0_i32, %arg0 : i32, i32
  }
  func.func @transform_1(%arg0: i32) -> (i32, i32) {
    %c0_i32 = arith.constant 0 : i32
    %c0_i32_0 = arith.constant 0 : i32
    return %c0_i32, %arg0 : i32, i32
  }
  func.func @transform_2(%arg0: i32) -> (i32, i32) {
    %c0_i32 = arith.constant 0 : i32
    %c0_i32_0 = arith.constant 0 : i32
    return %c0_i32, %arg0 : i32, i32
  }
  func.func @transform_3(%arg0: i32) -> (i32, i32) {
    %c0_i32 = arith.constant 0 : i32
    %c0_i32_0 = arith.constant 0 : i32
    return %arg0, %c0_i32 : i32, i32
  }
  func.func @transform_4(%arg0: i32) -> (i32, i32) {
    %c0_i32 = arith.constant 0 : i32
    %c0_i32_0 = arith.constant 0 : i32
    %c0_i32_1 = arith.constant 0 : i32
    return %c0_i32, %c0_i32_0 : i32, i32
  }
  func.func @transform_5(%arg0: i32) -> (i32, i32) {
    %c0_i32 = arith.constant 0 : i32
    %c0_i32_0 = arith.constant 0 : i32
    %c0_i32_1 = arith.constant 0 : i32
    return %c0_i32, %c0_i32_0 : i32, i32
  }
  func.func @transform_6(%arg0: i32) -> (i32, i32) {
    %c0_i32 = arith.constant 0 : i32
    %c0_i32_0 = arith.constant 0 : i32
    %c0_i32_1 = arith.constant 0 : i32
    return %c0_i32, %c0_i32_0 : i32, i32
  }
  func.func @transform_7(%arg0: i32) -> (i32, i32) {
    %c0_i32 = arith.constant 0 : i32
    %c0_i32_0 = arith.constant 0 : i32
    %c0_i32_1 = arith.constant 0 : i32
    return %c0_i32, %c0_i32_0 : i32, i32
  }
  func.func @transform_8(%arg0: i32) -> (i32, i32) {
    %c0_i32 = arith.constant 0 : i32
    %c0_i32_0 = arith.constant 0 : i32
    %c0_i32_1 = arith.constant 0 : i32
    return %c0_i32, %c0_i32_0 : i32, i32
  }
  func.func @transform_9(%arg0: i32) -> (i32, i32) {
    %c0_i32 = arith.constant 0 : i32
    %c0_i32_0 = arith.constant 0 : i32
    %c0_i32_1 = arith.constant 0 : i32
    return %c0_i32, %c0_i32_0 : i32, i32
  }
  func.func @transform_10(%arg0: i32) -> (i32, i32) {
    %c0_i32 = arith.constant 0 : i32
    %c0_i32_0 = arith.constant 0 : i32
    %c0_i32_1 = arith.constant 0 : i32
    return %c0_i32, %c0_i32_0 : i32, i32
  }
  func.func @transform_11(%arg0: i32) -> (i32, i32) {
    %c0_i32 = arith.constant 0 : i32
    %c0_i32_0 = arith.constant 0 : i32
    %c0_i32_1 = arith.constant 0 : i32
    return %c0_i32, %c0_i32_0 : i32, i32
  }
  func.func @transform_12(%arg0: i32) -> (i32, i32) {
    %c0_i32 = arith.constant 0 : i32
    %c0_i32_0 = arith.constant 0 : i32
    %c0_i32_1 = arith.constant 0 : i32
    return %c0_i32, %c0_i32_0 : i32, i32
  }
  func.func @transform_13(%arg0: i32) -> (i32, i32) {
    %c0_i32 = arith.constant 0 : i32
    %c0_i32_0 = arith.constant 0 : i32
    %c0_i32_1 = arith.constant 0 : i32
    return %c0_i32, %c0_i32_0 : i32, i32
  }
  func.func @transform_14(%arg0: i32) -> (i32, i32) {
    %c0_i32 = arith.constant 0 : i32
    %c0_i32_0 = arith.constant 0 : i32
    %c0_i32_1 = arith.constant 0 : i32
    return %c0_i32, %c0_i32_0 : i32, i32
  }
  func.func @transform_15(%arg0: i32) -> (i32, i32) {
    %c0_i32 = arith.constant 0 : i32
    %c0_i32_0 = arith.constant 0 : i32
    %c0_i32_1 = arith.constant 0 : i32
    return %c0_i32, %c0_i32_0 : i32, i32
  }
  func.func @transform_16(%arg0: i32) -> (i32, i32) {
    %c0_i32 = arith.constant 0 : i32
    %c0_i32_0 = arith.constant 0 : i32
    %c0_i32_1 = arith.constant 0 : i32
    return %c0_i32, %c0_i32_0 : i32, i32
  }
}

</mosaic_0001>

<bundles_post_ra>
// kernel: mlp_encoder_mvn.1
= control target key start
LH: loop header
LB: loop body
LE: loop exit
PB: predicated region body
PF: predicated region fallthrough
CT: control target
= control target key end

     0   :  { %s2232_s0 = inlined_call_operand.vmem [shape: f32[8,256], index: 0, kind: input, shape index: {}]   ;;  %s2233_s1 = inlined_call_operand.vmem [shape: f32[1,256], index: 1, kind: input, shape index: {}]   ;;  %s2234_s2 = inlined_call_operand.vmem [shape: f32[1,256], index: 2, kind: input, shape index: {}]   ;;  %s2235_s3 = inlined_call_operand.vmem [shape: bf16[256,128], index: 3, kind: input, shape index: {}]   ;;  %s2236_s4 = inlined_call_operand.vmem [shape: f32[1,128], index: 4, kind: input, shape index: {}]   ;;  %s2237_s5 = inlined_call_operand.vmem [shape: f32[1,128], index: 5, kind: input, shape index: {}]   ;;  %s2238_s6 = inlined_call_operand.vmem [shape: f32[1,128], index: 6, kind: input, shape index: {}]   ;;  %s2239_s7 = inlined_call_operand.vmem [shape: bf16[128,128], index: 7, kind: input, shape index: {}]   ;;  %s2240_s8 = inlined_call_operand.vmem [shape: f32[1,128], index: 8, kind: input, shape index: {}]   ;;  %s2241_s9 = inlined_call_operand.vmem [shape: bf16[128,128], index: 9, kind: input, shape index: {}]   ;;  %s2242_s10 = inlined_call_operand.vmem [shape: f32[1,128], index: 10, kind: input, shape index: {}]   ;;  %s2243_s11 = inlined_call_operand.vmem [shape: bf16[128,128], index: 11, kind: input, shape index: {}]   ;;  %s2244_s12 = inlined_call_operand.vmem [shape: f32[1,128], index: 12, kind: input, shape index: {}]   ;;  %s2245_s13 = inlined_call_operand.vmem [shape: f32[128,256], index: 13, kind: input, shape index: {}]   ;;  %s2246_s14 = inlined_call_operand.vmem [shape: f32[128,256], index: 14, kind: input, shape index: {}]   ;;  %s2247_s15 = inlined_call_operand.hbm [shape: f32[8,128], index: 15, kind: output, shape index: {0}]   ;;  %s2248_s16 = inlined_call_operand.vmem [shape: f32[8,256], index: 16, kind: output, shape index: {1}]  }
   0x1   :  { %2252 = sst [smem:[#allocation7_spill]] %s2232_s0 }
   0x2   :  { %2253 = sst [smem:[#allocation8_spill]] %s2244_s12 }
   0x3   :  { %2254 = sst [smem:[#allocation9_spill]] %s2247_s15 }
   0x4   :  { %2255 = sst [smem:[#allocation10_spill]] %s2248_s16 }
   0x5   :  { %22 = vsyncpa [#allocation4], 0  ;;  %s1831_s21 = smov 0  }
   0x6 LB: > { %2256 = sst [smem:[#allocation6_spill]] %s1738_s21  ;;  %s1837_s22 = sadd.s32 4294967295, %s1738_s21   ;;  %s1738_s21 = sphi %s1831_s21, %s28_s21  }
   0x7   : > { %p1408_p0 = scmp.ge.s32.totalorder %s1738_s21, 1  ;;  %p482_p1 = scmp.lt.s32.totalorder %s1738_s21, 3 }
   0x9   : > { %p483_p2 = pnand %p1408_p0, %p482_p1 }
   0xa   : > { %p537_p3 = scmp.lt.s32.totalorder (!%p483_p2), %s1837_s22, 1  ;;  %s1410_s23 = sshll.u32 (!%p483_p2), %s1837_s22, 4 }
   0xb   : > { %486 = sbr.rel (%p483_p2) target bundleno = 882 (0x372), region = 80  ;;  %p548_p4 = scmp.lt.s32.totalorder (!%p483_p2), %s1410_s23, 31 }
   0xc   : > { %s2257_s0 = sld [smem:[#allocation7_spill]] (!%p483_p2)  ;;  %p1412_p5 = scmp.ne.s32.totalorder (!%p483_p2), %s1837_s22, 0 }
  0x12   : > { %s1844_s24 = scalar_select %p537_p3, %s1837_s22, 1 }
  0x13   : > { %s2263_s23 = smov (!%p548_p4, %s1410_s23), 31  ;;  %557 = sbr.rel (%p1412_p5) target bundleno = 26 (0x1a), region = 84 }
  0x14   : > { %s1409_s25 = sshll.u32 %s1844_s24, 3  ;;  %s543_s28 = scalar_lea.vmem %s2233_s1, %s1844_s24  ;;  %v1740_v0 = vmov (!%p1412_p5), 0.0  }
  0x15   : > { %s540_s17 = scalar_lea.vmem %s2257_s0, %s1409_s25  ;;  %s546_s20 = scalar_lea.vmem %s2234_s2, %s1844_s24  ;;  %558 = vst [vmem:[#allocation2] sm:$0xff] (!%p1412_p5), %v1740_v0 }
  0x16   : > { %s1411_s21 = sshll.u32 %s2263_s23, 2 }
  0x17   : > { %s1861_s12 = scalar_lea.vmem %s2235_s3, %s1411_s21 }
  0x1a PF: > { %v1660_v1 = vld [vmem:[%s1861_s12] sm:$0xff]   ;;  %v1741_v2 = vmov 0.0   ;;  %v1661_v3 = vld [vmem:[%s1861_s12 + $0x8] sm:$0xff]   ;;  %vm1742_vm0 = vmmov 0   ;;  %v1662_v4 = vld [vmem:[%s1861_s12 + $0x10] sm:$0xff]   ;;  %p1423_p6 = scmp.ne.s32.totalorder %s1837_s22, 1 }
  0x1b   : > { %1494 = vmatprep.subr.bf16.mxu0 %v1741_v2  ;;  %1510 = vmatprep.mubr.msk.bf16.mxu0 %vm1742_vm0, %v1741_v2  ;;  %v559_v5 = vld [vmem:[%s540_s17] sm:$0xff]  ;;  %v1663_v7 = vld [vmem:[%s1861_s12 + $0x18] sm:$0xff]   ;;  %v1665_v13 = vld [vmem:[%s1861_s12 + $0x28] sm:$0xff]   ;;  %v1743_v42 = vmov (!%p1423_p6), 0.0   ;;  %vm1744_vm1 = vmmov (!%p1423_p6), 0   ;;  %s2258_s25 = sld [smem:[#allocation8_spill]] (!%p1423_p6) }
  0x1c   : > { %1495 = vmatpush3.bf16.msra.mxu0 %v1660_v1  ;;  %v560_v6 = vrot.slane %v559_v5, 4  ;;  %v1664_v10 = vld [vmem:[%s1861_s12 + $0x20] sm:$0xff]   ;;  %v1666_v16 = vld [vmem:[%s1861_s12 + $0x30] sm:$0xff]   ;;  %v1667_v19 = vld [vmem:[%s1861_s12 + $0x38] sm:$0xff]   ;;  %1534 = vmatprep.subr.bf16.mxu1 (!%p1423_p6), %v1743_v42  ;;  %s2259_s27 = sld [smem:[#allocation10_spill]] (!%p1423_p6) }
  0x1d   : > { %1496 = vmatprep.subr.bf16.mxu0 %v1741_v2  ;;  %v1413_v29 = vld [vmem:[%s543_s28] ss:$0 sm:$0xff]  ;;  %v1672_v44 = vld [vmem:[%s2239_s7 + $0x8] sm:$0xff] (!%p1423_p6)   ;;  %1550 = vmatprep.mubr.msk.bf16.mxu1 (!%p1423_p6), %vm1744_vm1, %v1743_v42  ;;  %v1674_v46 = vld [vmem:[%s2239_s7 + $0x10] sm:$0xff] (!%p1423_p6)  }
  0x1e   : > { %v561_v8 = vadd.f32 %v560_v6, %v559_v5  ;;  %v1414_v31 = vld [vmem:[%s546_s20] ss:$0 sm:$0xff]  ;;  %v1673_v45 = vld [vmem:[%s2241_s9 + $0x8] sm:$0xff] (!%p1423_p6)   ;;  %v1675_v47 = vld [vmem:[%s2241_s9 + $0x10] sm:$0xff] (!%p1423_p6)  }
  0x1f   : > { %v596_v35 = vld [vmem:[#allocation2] sm:$0xff]  ;;  %v1676_v48 = vld [vmem:[%s2239_s7 + $0x18] sm:$0xff] (!%p1423_p6)   ;;  %v1680_v55 = vld [vmem:[%s2239_s7 + $0x28] sm:$0xff] (!%p1423_p6)  }
  0x20   : > { %1497 = vmatpush3.bf16.msra.mxu0 %v1661_v3  ;;  %v562_v9 = vrot.slane %v561_v8, 2  ;;  %v1670_v41 = vld [vmem:[%s2239_s7] sm:$0xff] (!%p1423_p6)   ;;  %v1677_v49 = vld [vmem:[%s2241_s9 + $0x18] sm:$0xff] (!%p1423_p6)   ;;  %v1681_v56 = vld [vmem:[%s2241_s9 + $0x28] sm:$0xff] (!%p1423_p6)  }
  0x21   : > { %1498 = vmatprep.subr.bf16.mxu0 %v1741_v2  ;;  %v1671_v43 = vld [vmem:[%s2241_s9] sm:$0xff] (!%p1423_p6)   ;;  %v1682_v59 = vld [vmem:[%s2239_s7 + $0x30] sm:$0xff] (!%p1423_p6)   ;;  %v1684_v63 = vld [vmem:[%s2239_s7 + $0x38] sm:$0xff] (!%p1423_p6)  }
  0x22   : > { %v563_v11 = vadd.f32 %v562_v9, %v561_v8  ;;  %1535 = vmatpush3.bf16.msra.mxu1 (!%p1423_p6), %v1671_v43  ;;  %v1678_v50 = vld [vmem:[%s2239_s7 + $0x20] sm:$0xff] (!%p1423_p6)   ;;  %v1683_v60 = vld [vmem:[%s2241_s9 + $0x30] sm:$0xff] (!%p1423_p6)   ;;  %v1685_v0 = vld [vmem:[%s2241_s9 + $0x38] sm:$0xff] (!%p1423_p6)  }
  0x23   : > { %1536 = vmatprep.subr.bf16.mxu1 (!%p1423_p6), %v1743_v42  ;;  %v1679_v51 = vld [vmem:[%s2241_s9 + $0x20] sm:$0xff] (!%p1423_p6)   ;;  %v1156_v43 = vld [vmem:[%s2246_s14 + $0x48] sm:$0xff] (!%p1423_p6) }
  0x24   : > { %1499 = vmatpush3.bf16.msra.mxu0 %v1662_v4  ;;  %v564_v12 = vrot.slane %v563_v11, 1  ;;  %v1424_v53 = vld [vmem:[%s2236_s4] ss:$0 sm:$0xff] (!%p1423_p6) }
  0x25   : > { %1500 = vmatprep.subr.bf16.mxu0 %v1741_v2 }
  0x26   : > { %v565_v14 = vadd.f32 %v564_v12, %v563_v11  ;;  %1537 = vmatpush3.bf16.msra.mxu1 (!%p1423_p6), %v1673_v45 }
  0x27   : > { %1538 = vmatprep.subr.bf16.mxu1 (!%p1423_p6), %v1743_v42 }
  0x28   : > { %1501 = vmatpush3.bf16.msra.mxu0 %v1663_v7  ;;  %v567_v15 = vmul.f32 0.125, %v565_v14 }
  0x29   : > { %1502 = vmatprep.subr.bf16.mxu0 %v1741_v2 }
  0x2a   : > { %v568_v17 = vsub.f32 %v559_v5, %v567_v15  ;;  %1539 = vmatpush3.bf16.msra.mxu1 (!%p1423_p6), %v1675_v47  ;;  %v1425_v15 = vld [vmem:[%s2237_s5] ss:$0 sm:$0xff] (!%p1423_p6)  ;;  %v1157_v47 = vld [vmem:[%s2246_s14 + $0x50] sm:$0xff] (!%p1423_p6) }
  0x2b   : > { %1540 = vmatprep.subr.bf16.mxu1 (!%p1423_p6), %v1743_v42 }
  0x2c   : > { %1503 = vmatpush3.bf16.msra.mxu0 %v1664_v10  ;;  %v569_v18 = vmul.f32 %v568_v17, %v568_v17 }
  0x2d   : > { %1504 = vmatprep.subr.bf16.mxu0 %v1741_v2 }
  0x2e   : > { %v570_v20 = vrot.slane %v569_v18, 4  ;;  %1541 = vmatpush3.bf16.msra.mxu1 (!%p1423_p6), %v1677_v49  ;;  %v1160_v49 = vld [vmem:[%s2246_s14 + $0x68] sm:$0xff] (!%p1423_p6) }
  0x2f   : > { %1542 = vmatprep.subr.bf16.mxu1 (!%p1423_p6), %v1743_v42 }
  0x30   : > { %1505 = vmatpush3.bf16.msra.mxu0 %v1665_v13  ;;  %v571_v21 = vadd.f32 %v570_v20, %v569_v18 }
  0x31   : > { %1506 = vmatprep.subr.bf16.mxu0 %v1741_v2 }
  0x32   : > { %v572_v22 = vrot.slane %v571_v21, 2  ;;  %1543 = vmatpush3.bf16.msra.mxu1 (!%p1423_p6), %v1679_v51 }
  0x33   : > { %1544 = vmatprep.subr.bf16.mxu1 (!%p1423_p6), %v1743_v42 }
  0x34   : > { %1507 = vmatpush3.bf16.msra.mxu0 %v1666_v16  ;;  %v573_v23 = vadd.f32 %v572_v22, %v571_v21  ;;  %v1686_v21 = vld [vmem:[%s2243_s11] sm:$0xff] (!%p1423_p6)  }
  0x35   : > { %1508 = vmatprep.subr.bf16.mxu0 %v1741_v2 }
  0x36   : > { %v574_v24 = vrot.slane %v573_v23, 1  ;;  %1545 = vmatpush3.bf16.msra.mxu1 (!%p1423_p6), %v1681_v56  ;;  %v1166_v56 = vld [vmem:[%s2246_s14 + $0x98] sm:$0xff] (!%p1423_p6) }
  0x37   : > { %1546 = vmatprep.subr.bf16.mxu1 (!%p1423_p6), %v1743_v42 }
  0x38   : > { %1509 = vmatpush3.bf16.msra.mxu0 %v1667_v19  ;;  %v575_v25 = vadd.f32 %v574_v24, %v573_v23  ;;  %v1687_v23 = vld [vmem:[%s2243_s11 + $0x8] sm:$0xff] (!%p1423_p6)   ;;  %v1688_v24 = vld [vmem:[%s2243_s11 + $0x10] sm:$0xff] (!%p1423_p6)  }
  0x39   : > { %1514 = vmatprep.subr.bf16.mxu0 (!%p1423_p6), %v1743_v42 }
  0x3a   : > { %v576_v26 = vmul.f32 0.125, %v575_v25  ;;  %1547 = vmatpush3.bf16.msra.mxu1 (!%p1423_p6), %v1683_v60  ;;  %v1689_v25 = vld [vmem:[%s2243_s11 + $0x18] sm:$0xff] (!%p1423_p6)  }
  0x3b   : > { %1548 = vmatprep.subr.bf16.mxu1 (!%p1423_p6), %v1743_v42 }
  0x3c   : > { %v577_v27 = vadd.f32 1e-05, %v576_v26  ;;  %v1690_v26 = vld [vmem:[%s2243_s11 + $0x20] sm:$0xff] (!%p1423_p6)  }
  0x3e   : > { %1668 = vrsqrt.f32 %v577_v27  ;;  %1549 = vmatpush3.bf16.msra.mxu1 (!%p1423_p6), %v1685_v0  ;;  %v1691_v27 = vld [vmem:[%s2243_s11 + $0x28] sm:$0xff] (!%p1423_p6)   ;;  %v1167_v0 = vld [vmem:[%s2246_s14 + $0xa0] sm:$0xff] (!%p1423_p6) }
  0x48   : > { %v1669_v28 = vpop.eup %1668 }
  0x49   : > { %v579_v30 = vmul.f32 %v1669_v28, %v568_v17  ;;  %v1426_v17 = vld [vmem:[%s2238_s6] ss:$0 sm:$0xff] (!%p1423_p6)  ;;  %v1692_v28 = vld [vmem:[%s2243_s11 + $0x30] sm:$0xff] (!%p1423_p6)  }
  0x4b   : > { %v587_v32 = vmul.f32 %v1413_v29, %v579_v30  ;;  %v1693_v29 = vld [vmem:[%s2243_s11 + $0x38] sm:$0xff] (!%p1423_p6)   ;;  %v1148_v30 = vld [vmem:[%s2246_s14 + $0x8] sm:$0xff] (!%p1423_p6) }
  0x4d   : > { %v595_v33 = vadd.f32 %v1414_v31, %v587_v32  ;;  %v1150_v31 = vld [vmem:[%s2246_s14 + $0x18] sm:$0xff] (!%p1423_p6) }
  0x4e   : > { %v1574_v32 = vpack.c.bf16 (!%p1423_p6), %v1150_v31, %v1148_v30 }
  0x4f   : > { %v597_v34 = vpack.c.bf16 %v595_v33, %v595_v33  ;;  %v1147_v33 = vld [vmem:[%s2246_s14] sm:$0xff] (!%p1423_p6) }
  0x50   : > { %1575 = vmatprep.subr.bf16.mxu1 (!%p1423_p6), %v1574_v32 }
  0x51   : > { %1511 = vmatmul.mubr.bf16.vlgmr.msra.gmra.mrb[0].mxu0 %v597_v34  ;;  %v1149_v34 = vld [vmem:[%s2246_s14 + $0x10] sm:$0xff] (!%p1423_p6) }
  0x52   : > { %1515 = vmatpush3.bf16.msra.mxu0 (!%p1423_p6), %v1670_v41  ;;  %1530 = vmatprep.mubr.msk.bf16.mxu0 (!%p1423_p6), %vm1744_vm1, %v1743_v42 }
  0x53   : > { %1516 = vmatprep.subr.bf16.mxu0 (!%p1423_p6), %v1743_v42 }
  0x56   : > { %1517 = vmatpush3.bf16.msra.mxu0 (!%p1423_p6), %v1672_v44  ;;  %v1158_v44 = vld [vmem:[%s2246_s14 + $0x58] sm:$0xff] (!%p1423_p6) }
  0x57   : > { %1518 = vmatprep.subr.bf16.mxu0 (!%p1423_p6), %v1743_v42  ;;  %v1582_v45 = vpack.c.bf16 (!%p1423_p6), %v1158_v44, %v1156_v43 }
  0x5a   : > { %1519 = vmatpush3.bf16.msra.mxu0 (!%p1423_p6), %v1674_v46  ;;  %v1155_v46 = vld [vmem:[%s2246_s14 + $0x40] sm:$0xff] (!%p1423_p6) }
  0x5b   : > { %1520 = vmatprep.subr.bf16.mxu0 (!%p1423_p6), %v1743_v42 }
  0x5e   : > { %1521 = vmatpush3.bf16.msra.mxu0 (!%p1423_p6), %v1676_v48  ;;  %v1584_v48 = vpack.c.bf16 (!%p1423_p6), %v1157_v47, %v1155_v46 }
  0x5f   : > { %1522 = vmatprep.subr.bf16.mxu0 (!%p1423_p6), %v1743_v42 }
  0x62   : > { %1523 = vmatpush3.bf16.msra.mxu0 (!%p1423_p6), %v1678_v50  ;;  %v1162_v50 = vld [vmem:[%s2246_s14 + $0x78] sm:$0xff] (!%p1423_p6) }
  0x63   : > { %1524 = vmatprep.subr.bf16.mxu0 (!%p1423_p6), %v1743_v42  ;;  %v1586_v51 = vpack.c.bf16 (!%p1423_p6), %v1162_v50, %v1160_v49  ;;  %v1117_v49 = vld [vmem:[%s2245_s13 + $0x10] sm:$0xff] (!%p1423_p6) }
  0x66   : > { %1525 = vmatpush3.bf16.msra.mxu0 (!%p1423_p6), %v1680_v55  ;;  %v1164_v55 = vld [vmem:[%s2246_s14 + $0x88] sm:$0xff] (!%p1423_p6) }
  0x67   : > { %1526 = vmatprep.subr.bf16.mxu0 (!%p1423_p6), %v1743_v42 }
  0x6a   : > { %1527 = vmatpush3.bf16.msra.mxu0 (!%p1423_p6), %v1682_v59  ;;  %v1165_v59 = vld [vmem:[%s2246_s14 + $0x90] sm:$0xff] (!%p1423_p6) }
  0x6b   : > { %1528 = vmatprep.subr.bf16.mxu0 (!%p1423_p6), %v1743_v42 }
  0x6e   : > { %1529 = vmatpush3.bf16.msra.mxu0 (!%p1423_p6), %v1684_v63 }
  0x6f   : > { %1554 = vmatprep.subr.bf16.mxu0 (!%p1423_p6), %v1743_v42 }
 0x121   : > { %707 = sbr.rel (%p1423_p6) target bundleno = 851 (0x353), region = 88 }
 0x124   : > { %v696_v36 = vpop.f32.mrb[0].mxu0 }
 0x125   : > { %v702_v37 = vadd.f32 %v696_v36, %v596_v35  ;;  %v1512_v38 = vpop.f32.mrb[1].mxu0  ;;  %v1576_v35 = vpack.c.bf16 (!%p1423_p6), %v1149_v34, %v1147_v33  ;;  %v1152_v36 = vld [vmem:[%s2246_s14 + $0x28] sm:$0xff] (!%p1423_p6) }
 0x126   : > { %v699_v39 = vpop.f32.mrb[2].mxu0 }
 0x127   : > { %703 = vst [vmem:[#allocation2] sm:$0xff] %v702_v37  ;;  %v1513_v40 = vpop.f32.mrb[3].mxu0  ;;  %v1154_v37 = vld [vmem:[%s2246_s14 + $0x38] sm:$0xff] (!%p1423_p6)  ;;  %v1151_v39 = vld [vmem:[%s2246_s14 + $0x20] sm:$0xff] (!%p1423_p6) }
 0x128   : > { %v1578_v38 = vpack.c.bf16 %v1154_v37, %v1152_v36  ;;  %v1153_v40 = vld [vmem:[%s2246_s14 + $0x30] sm:$0xff] }
 0x129   : > { %v1580_v41 = vpack.c.bf16 %v1153_v40, %v1151_v39 }
 0x12e   : > { %v708_v52 = vld [vmem:[#allocation2] sm:$0xff] }
 0x12f   : > { %v716_v54 = vadd.f32 %v1424_v53, %v708_v52  ;;  %v1159_v52 = vld [vmem:[%s2246_s14 + $0x60] sm:$0xff]  ;;  %v1161_v53 = vld [vmem:[%s2246_s14 + $0x70] sm:$0xff] }
 0x131   : > { %v717_v57 = vrot.slane %v716_v54, 4 }
 0x133   : > { %v718_v58 = vadd.f32 %v717_v57, %v716_v54  ;;  %v1590_v57 = vpack.c.bf16 %v1166_v56, %v1164_v55 }
 0x135   : > { %v719_v61 = vrot.slane %v718_v58, 2 }
 0x137   : > { %v720_v62 = vadd.f32 %v719_v61, %v718_v58  ;;  %v1163_v58 = vld [vmem:[%s2246_s14 + $0x80] sm:$0xff]  ;;  %v1168_v61 = vld [vmem:[%s2246_s14 + $0xa8] sm:$0xff] }
 0x138   : > { %v1592_v60 = vpack.c.bf16 %v1165_v59, %v1163_v58  ;;  %v1119_v58 = vld [vmem:[%s2245_s13 + $0x20] sm:$0xff]  ;;  %v1121_v59 = vld [vmem:[%s2245_s13 + $0x30] sm:$0xff] }
 0x139   : > { %v721_v1 = vrot.slane %v720_v62, 1 }
 0x13b   : > { %v722_v2 = vadd.f32 %v721_v1, %v720_v62  ;;  %v1170_v62 = vld [vmem:[%s2246_s14 + $0xb8] sm:$0xff]  ;;  %v1169_v1 = vld [vmem:[%s2246_s14 + $0xb0] sm:$0xff] }
 0x13c   : > { %v1594_v63 = vpack.c.bf16 %v1170_v62, %v1168_v61 }
 0x13d   : > { %v723_v3 = vmul.f32 0.125, %v722_v2  ;;  %v1596_v2 = vpack.c.bf16 %v1169_v1, %v1167_v0  ;;  %v1126_v0 = vld [vmem:[%s2245_s13 + $0x58] sm:$0xff] }
 0x13f   : > { %v724_v4 = vsub.f32 %v716_v54, %v723_v3  ;;  %v1588_v54 = vpack.c.bf16 %v1161_v53, %v1159_v52  ;;  %v1172_v3 = vld [vmem:[%s2246_s14 + $0xc8] sm:$0xff]  ;;  %v1122_v52 = vld [vmem:[%s2245_s13 + $0x38] sm:$0xff] }
 0x141   : > { %v725_v5 = vmul.f32 %v724_v4, %v724_v4 }
 0x143   : > { %v726_v6 = vrot.slane %v725_v5, 4 }
 0x145   : > { %v727_v7 = vadd.f32 %v726_v6, %v725_v5  ;;  %v1171_v6 = vld [vmem:[%s2246_s14 + $0xc0] sm:$0xff] }
 0x147   : > { %v728_v8 = vrot.slane %v727_v7, 2 }
 0x149   : > { %v729_v9 = vadd.f32 %v728_v8, %v727_v7  ;;  %v1173_v7 = vld [vmem:[%s2246_s14 + $0xd0] sm:$0xff] }
 0x14a   : > { %v1600_v8 = vpack.c.bf16 %v1173_v7, %v1171_v6  ;;  %v1123_v7 = vld [vmem:[%s2245_s13 + $0x40] sm:$0xff] }
 0x14b   : > { %v730_v10 = vrot.slane %v729_v9, 1 }
 0x14d   : > { %v731_v11 = vadd.f32 %v730_v10, %v729_v9  ;;  %v1176_v9 = vld [vmem:[%s2246_s14 + $0xe8] sm:$0xff]  ;;  %v1178_v10 = vld [vmem:[%s2246_s14 + $0xf8] sm:$0xff] }
 0x14f   : > { %v732_v12 = vmul.f32 0.125, %v731_v11  ;;  %v1602_v11 = vpack.c.bf16 %v1178_v10, %v1176_v9  ;;  %v1128_v9 = vld [vmem:[%s2245_s13 + $0x68] sm:$0xff]  ;;  %v1130_v10 = vld [vmem:[%s2245_s13 + $0x78] sm:$0xff] }
 0x151   : > { %v733_v13 = vadd.f32 1e-05, %v732_v12  ;;  %v1175_v12 = vld [vmem:[%s2246_s14 + $0xe0] sm:$0xff] }
 0x153   : > { %1694 = vrsqrt.f32 %v733_v13  ;;  %v1177_v13 = vld [vmem:[%s2246_s14 + $0xf0] sm:$0xff] }
 0x15d   : > { %v1695_v14 = vpop.eup %1694 }
 0x15e   : > { %v735_v16 = vmul.f32 %v1695_v14, %v724_v4  ;;  %v1174_v4 = vld [vmem:[%s2246_s14 + $0xd8] sm:$0xff]  ;;  %v1604_v14 = vpack.c.bf16 %v1177_v13, %v1175_v12  ;;  %v1127_v12 = vld [vmem:[%s2245_s13 + $0x60] sm:$0xff]  ;;  %v1129_v13 = vld [vmem:[%s2245_s13 + $0x70] sm:$0xff] }
 0x15f   : > { %v1598_v5 = vpack.c.bf16 %v1174_v4, %v1172_v3  ;;  %v1612_v4 = vpack.c.bf16 %v1121_v59, %v1119_v58 }
 0x160   : > { %v743_v18 = vmul.f32 %v1425_v15, %v735_v16  ;;  %v1116_v15 = vld [vmem:[%s2245_s13 + $0x8] sm:$0xff]  ;;  %v1118_v16 = vld [vmem:[%s2245_s13 + $0x18] sm:$0xff] }
 0x162   : > { %v751_v19 = vadd.f32 %v1426_v17, %v743_v18  ;;  %v1606_v17 = vpack.c.bf16 %v1118_v16, %v1116_v15  ;;  %v1427_v18 = vld [vmem:[%s2240_s8] ss:$0 sm:$0xff]  ;;  %v1134_v15 = vld [vmem:[%s2245_s13 + $0x98] sm:$0xff]  ;;  %v1620_v16 = vpack.c.bf16 %v1129_v13, %v1127_v12 }
 0x164   : > { %v752_v20 = vmax.f32 %v751_v19, 0.0  ;;  %v1436_v19 = vld [vmem:[%s2242_s10] ss:$0 sm:$0xff] }
 0x166   : > { %v753_v22 = vpack.c.bf16 %v752_v20, %v752_v20 }
 0x168   : > { %1531 = vmatmul.mubr.bf16.vlgmr.msra.gmra.mrb[0].mxu0 %v753_v22  ;;  %1551 = vmatmul.mubr.bf16.vlgmr.msra.gmra.mrb[0].mxu1 %v753_v22 }
 0x169   : > { %1555 = vmatpush3.bf16.msra.mxu0 %v1686_v21  ;;  %1570 = vmatprep.mubr.msk.bf16.mxu0 %vm1744_vm1, %v1743_v42 }
 0x16a   : > { %1556 = vmatprep.subr.bf16.mxu0 %v1743_v42  ;;  %1243 = vmatprep.mubr.f32.mxu1 %v1743_v42 }
 0x16b   : > { %1577 = vmatpush1.bf16.msra.mxu1 %v1576_v35 }
 0x16c   : > { %1579 = vmatprep.subr.bf16.mxu1 %v1578_v38 }
 0x16d   : > { %1557 = vmatpush3.bf16.msra.mxu0 %v1687_v23 }
 0x16e   : > { %1558 = vmatprep.subr.bf16.mxu0 %v1743_v42 }
 0x16f   : > { %1581 = vmatpush1.bf16.msra.mxu1 %v1580_v41 }
 0x170   : > { %1583 = vmatprep.subr.bf16.mxu1 %v1582_v45 }
 0x171   : > { %1559 = vmatpush3.bf16.msra.mxu0 %v1688_v24 }
 0x172   : > { %1560 = vmatprep.subr.bf16.mxu0 %v1743_v42 }
 0x173   : > { %1585 = vmatpush1.bf16.msra.mxu1 %v1584_v48  ;;  %v1115_v48 = vld [vmem:[%s2245_s13] sm:$0xff] }
 0x174   : > { %1587 = vmatprep.subr.bf16.mxu1 %v1586_v51  ;;  %v1120_v51 = vld [vmem:[%s2245_s13 + $0x28] sm:$0xff]  ;;  %v1608_v56 = vpack.c.bf16 %v1117_v49, %v1115_v48 }
 0x175   : > { %1561 = vmatpush3.bf16.msra.mxu0 %v1689_v25 }
 0x176   : > { %1562 = vmatprep.subr.bf16.mxu0 %v1743_v42 }
 0x177   : > { %1589 = vmatpush1.bf16.msra.mxu1 %v1588_v54 }
 0x178   : > { %1591 = vmatprep.subr.bf16.mxu1 %v1590_v57  ;;  %v1610_v57 = vpack.c.bf16 %v1122_v52, %v1120_v51 }
 0x179   : > { %1563 = vmatpush3.bf16.msra.mxu0 %v1690_v26 }
 0x17a   : > { %1564 = vmatprep.subr.bf16.mxu0 %v1743_v42 }
 0x17b   : > { %1593 = vmatpush1.bf16.msra.mxu1 %v1592_v60 }
 0x17c   : > { %1595 = vmatprep.subr.bf16.mxu1 %v1594_v63  ;;  %v1124_v63 = vld [vmem:[%s2245_s13 + $0x48] sm:$0xff] }
 0x17d   : > { %1565 = vmatpush3.bf16.msra.mxu0 %v1691_v27  ;;  %v1614_v6 = vpack.c.bf16 %v1126_v0, %v1124_v63 }
 0x17e   : > { %1566 = vmatprep.subr.bf16.mxu0 %v1743_v42 }
 0x17f   : > { %1597 = vmatpush1.bf16.msra.mxu1 %v1596_v2 }
 0x180   : > { %1599 = vmatprep.subr.bf16.mxu1 %v1598_v5 }
 0x181   : > { %1567 = vmatpush3.bf16.msra.mxu0 %v1692_v28 }
 0x182   : > { %1568 = vmatprep.subr.bf16.mxu0 %v1743_v42 }
 0x183   : > { %1601 = vmatpush1.bf16.msra.mxu1 %v1600_v8  ;;  %v1125_v8 = vld [vmem:[%s2245_s13 + $0x50] sm:$0xff] }
 0x184   : > { %1603 = vmatprep.subr.bf16.mxu1 %v1602_v11  ;;  %v1618_v11 = vpack.c.bf16 %v1130_v10, %v1128_v9 }
 0x185   : > { %1569 = vmatpush3.bf16.msra.mxu0 %v1693_v29 }
 0x187   : > { %1605 = vmatpush1.bf16.msra.mxu1 %v1604_v14  ;;  %v1132_v14 = vld [vmem:[%s2245_s13 + $0x88] sm:$0xff] }
 0x188   : > { %1571 = vmatmul.mubr.bf16.vlgmr.msra.gmra.mrb[4].mxu0 %v753_v22  ;;  %1607 = vmatprep.subr.bf16.mxu1 %v1606_v17  ;;  %v1622_v17 = vpack.c.bf16 %v1134_v15, %v1132_v14 }
 0x23b   : > { %v859_v20 = vpop.f32.mrb[0].mxu0  ;;  %v990_v21 = vpop.f32.mrb[0].mxu1 }
 0x23c   : > { %v860_v22 = vadd.f32 %v1427_v18, %v859_v20  ;;  %v991_v23 = vadd.f32 %v1436_v19, %v990_v21  ;;  %v1552_v24 = vpop.f32.mrb[1].mxu1  ;;  %v1532_v25 = vpop.f32.mrb[1].mxu0  ;;  %v1131_v18 = vld [vmem:[%s2245_s13 + $0x80] sm:$0xff]  ;;  %v1133_v19 = vld [vmem:[%s2245_s13 + $0x90] sm:$0xff]  ;;  %v1136_v20 = vld [vmem:[%s2245_s13 + $0xa8] sm:$0xff] }
 0x23d   : > { %v993_v26 = vpop.f32.mrb[2].mxu1  ;;  %v862_v27 = vpop.f32.mrb[2].mxu0  ;;  %v1138_v21 = vld [vmem:[%s2245_s13 + $0xb8] sm:$0xff] }
 0x23e   : > { %v865_v28 = vrot.slane %v860_v22, 4  ;;  %v997_v29 = vmin.f32 %v991_v23, 20.0  ;;  %v1553_v30 = vpop.f32.mrb[3].mxu1  ;;  %v1533_v31 = vpop.f32.mrb[3].mxu0  ;;  %vm996_vm2 = vcmp.gt.f32.partialorder %v991_v23, 20.0  ;;  %v1626_v25 = vpack.c.bf16 %v1138_v21, %v1136_v20  ;;  %v1135_v26 = vld [vmem:[%s2245_s13 + $0xa0] sm:$0xff] }
 0x23f   : > { %v1137_v27 = vld [vmem:[%s2245_s13 + $0xb0] sm:$0xff] }
 0x240   : > { %v866_v32 = vadd.f32 %v865_v28, %v860_v22  ;;  %v998_v33 = vmul.f32 1.442695, %v997_v29  ;;  %v1140_v28 = vld [vmem:[%s2245_s13 + $0xc8] sm:$0xff]  ;;  %v1142_v29 = vld [vmem:[%s2245_s13 + $0xd8] sm:$0xff]  ;;  %v1628_v30 = vpack.c.bf16 %v1137_v27, %v1135_v26 }
 0x241   : > { %v1630_v31 = vpack.c.bf16 %v1142_v29, %v1140_v28 }
 0x242   : > { %v867_v34 = vrot.slane %v866_v32, 2  ;;  %1696 = vpow2.f32 %v998_v33  ;;  %v1141_v33 = vld [vmem:[%s2245_s13 + $0xd0] sm:$0xff] }
 0x244   : > { %v868_v35 = vadd.f32 %v867_v34, %v866_v32  ;;  %v1139_v32 = vld [vmem:[%s2245_s13 + $0xc0] sm:$0xff]  ;;  %v1144_v34 = vld [vmem:[%s2245_s13 + $0xe8] sm:$0xff] }
 0x246   : > { %v869_v36 = vrot.slane %v868_v35, 1 }
 0x248   : > { %v870_v37 = vadd.f32 %v869_v36, %v868_v35  ;;  %v1146_v35 = vld [vmem:[%s2245_s13 + $0xf8] sm:$0xff]  ;;  %v1632_v36 = vpack.c.bf16 %v1141_v33, %v1139_v32 }
 0x24a   : > { %v871_v38 = vmul.f32 0.125, %v870_v37  ;;  %v1634_v37 = vpack.c.bf16 %v1146_v35, %v1144_v34 }
 0x24c   : > { %v1697_v39 = vpop.eup %1696  ;;  %v872_v40 = vsub.f32 %v860_v22, %v871_v38  ;;  %v1143_v38 = vld [vmem:[%s2245_s13 + $0xe0] sm:$0xff] }
 0x24d   : > { %v1000_v41 = vadd.f32 1.0, %v1697_v39  ;;  %v1145_v39 = vld [vmem:[%s2245_s13 + $0xf0] sm:$0xff] }
 0x24e   : > { %v873_v43 = vmul.f32 %v872_v40, %v872_v40 }
 0x24f   : > { %1698 = vlog2.f32 %v1000_v41  ;;  %v1636_v41 = vpack.c.bf16 %v1145_v39, %v1143_v38 }
 0x250   : > { %v874_v44 = vrot.slane %v873_v43, 4 }
 0x252   : > { %v875_v45 = vadd.f32 %v874_v44, %v873_v43 }
 0x254   : > { %v876_v46 = vrot.slane %v875_v45, 2 }
 0x256   : > { %v877_v47 = vadd.f32 %v876_v46, %v875_v45 }
 0x258   : > { %v878_v50 = vrot.slane %v877_v47, 1 }
 0x259   : > { %v1699_v53 = vpop.eup %1698 }
 0x25a   : > { %v879_v54 = vadd.f32 %v878_v50, %v877_v47  ;;  %v1002_v55 = vmul.f32 0.6931472, %v1699_v53 }
 0x25b   : > { %v2121_v60 = vpop.f32.mrb[4].mxu0 }
 0x25c   : > { %v880_v61 = vmul.f32 0.125, %v879_v54  ;;  %v1003_v62 = vsel %vm996_vm2, %v991_v23, %v1002_v55  ;;  %v1572_v1 = vpop.f32.mrb[5].mxu0  ;;  %v1624_v23 = vpack.c.bf16 %v1133_v19, %v1131_v18 }
 0x25d   : > { %1244 = vmatmul.mubr.f32.vlgmr.msra.gmra.mrb[4].mxu1 %v1003_v62  ;;  %v1112_v2 = vpop.f32.mrb[6].mxu0 }
 0x25e   : > { %v881_v3 = vadd.f32 1e-05, %v880_v61  ;;  %1609 = vmatpush1.bf16.msra.mxu1 %v1608_v56  ;;  %v1573_v5 = vpop.f32.mrb[7].mxu0  ;;  %1314 = vmatprep.mubr.f32.mxu1 %v1743_v42  ;;  %v1616_v42 = vpack.c.bf16 %v1125_v8, %v1123_v7 }
 0x25f   : > { %1611 = vmatprep.subr.bf16.mxu1 %v1610_v57 }
 0x260   : > { %1700 = vrsqrt.f32 %v881_v3 }
 0x262   : > { %1613 = vmatpush1.bf16.msra.mxu1 %v1612_v4 }
 0x263   : > { %1615 = vmatprep.subr.bf16.mxu1 %v1614_v6 }
 0x266   : > { %1617 = vmatpush1.bf16.msra.mxu1 %v1616_v42 }
 0x267   : > { %1619 = vmatprep.subr.bf16.mxu1 %v1618_v11 }
 0x26a   : > { %v1701_v22 = vpop.eup %1700  ;;  %1621 = vmatpush1.bf16.msra.mxu1 %v1620_v16 }
 0x26b   : > { %v883_v24 = vmul.f32 %v1701_v22, %v872_v40  ;;  %1623 = vmatprep.subr.bf16.mxu1 %v1622_v17  ;;  %v1445_v40 = vld [vmem:[%s2258_s25] ss:$0 sm:$0xff] }
 0x26c   : > { %v1110_v43 = vadd.f32 %v1445_v40, %v2121_v60 }
 0x26d   : > { %884 = vst [vmem:[#allocation3] sm:$0xff] %v883_v24 }
 0x26e   : > { %1625 = vmatpush1.bf16.msra.mxu1 %v1624_v23 }
 0x26f   : > { %1627 = vmatprep.subr.bf16.mxu1 %v1626_v25 }
 0x272   : > { %1629 = vmatpush1.bf16.msra.mxu1 %v1628_v30 }
 0x273   : > { %1631 = vmatprep.subr.bf16.mxu1 %v1630_v31 }
 0x276   : > { %1633 = vmatpush1.bf16.msra.mxu1 %v1632_v36 }
 0x277   : > { %1635 = vmatprep.subr.bf16.mxu1 %v1634_v37 }
 0x27a   : > { %1637 = vmatpush1.bf16.msra.mxu1 %v1636_v41 }
 0x27d   : > { %1315 = vmatmul.mubr.f32.vlgmr.msra.gmra.mrb[4].mxu1 %v1110_v43 }
 0x350   : > { %v1316_v44 = vpop.f32.mrb[4].mxu1 }
 0x351   : > { %1321 = vst [vmem:[%s2259_s27] sm:$0xff] %v1316_v44  ;;  %v1318_v45 = vpop.f32.mrb[5].mxu1 }
 0x352   : > { %1322 = vst [vmem:[%s2259_s27 + $0x8] sm:$0xff] %v1318_v45 }
 0x353 PF: > { %p1644_p7 = scmp.eq.s32.totalorder %s1837_s22, 1  ;;  %s1745_s30 = smov [#allocation3]  }
 0x354   : > { %s1330_s0 = sshll.u32 %s1745_s30, 4  ;;  %s1331_s0 = int_to_ptr.vmem [resolvable:$true] %s1330_s0 }
 0x355   : > { %s1702_s17 = scalar_lea.vmem %s1331_s0, 128  ;;  %p1709_p11 = scmp.lt.s32.totalorder %s1331_s0, %s1331_s0 }
 0x356   : > { %p1703_p8 = scmp.ne.s32.totalorder %s1331_s0, %s1702_s17  ;;  %p1710_p12 = scmp.lt.s32.totalorder %s1702_s17, %s1702_s17 }
 0x358   : > { %p1704_p9 = pnand %p1703_p8, %p1644_p7  ;;  %p1711_p13 = por %p1710_p12, %p1709_p11 }
 0x35a   : > { %p1705_p10 = pneg %p1704_p9 }
 0x35c   : > { %p1712_p0 = pnand %p1711_p13, %p1705_p10 }
 0x35e   : > { %1715 = shalt.err (!%p1712_p0)
}
 0x35f   : > { %s2260_s20 = sld [smem:[#allocation9_spill]] }
 0x365   : > { %s1716_s15 = scalar_lea.hbm %s2260_s20, 128 }
 0x366   : > { %p1717_p1 = scmp.ne.s32.totalorder %s2260_s20, %s1716_s15  ;;  %p1722_p4 = scmp.lt.u32.totalorder %s1716_s15, %s2260_s20 }
 0x368   : > { %p1718_p2 = pnand %p1717_p1, %p1644_p7 }
 0x36a   : > { %p1719_p3 = pneg %p1718_p2 }
 0x36c   : > { %p1724_p5 = pnand %p1722_p4, %p1719_p3 }
 0x36e   : > { %1727 = shalt.err (!%p1724_p5)
}
 0x36f   : > { %1641 = dma.vmem_to_hbm [thread:$0]  (%p1644_p7), %s1331_s0, 128, %s2260_s20, [#allocation4]  }
 0x370   : > { %1733 = dma.done.wait (%p1644_p7), [#allocation4], 128  }
 0x371   : > { %1735 = vsyncadd (%p1644_p7), [#allocation4], 4294967168 }
 0x372 PF: > { %s2261_s26 = sld [smem:[#allocation6_spill]] }
 0x378   : > { %s28_s21 = sadd.s32 1, %s2261_s26  }
 0x379   : > { %p25_p6 = scmp.ge.s32.totalorder %s28_s21, 4  }
 0x37b   :  { %27 = sbr.rel (!%p25_p6) target bundleno = 6 (0x6), region = 132 }
 0x382   :  { %1349 = vsyncpa [#allocation4], 1 }
 0x383   :  { %1351 = vsyncpa [#allocation4 + $0x1], 1 }

</bundles_post_ra>
